<compile_context>
chip_gen: v7x
topology: tpu7x:2x2x1
jax: 0.10.0
libtpu: 0.0.40
codegen_flags: <defaults>
</compile_context>

<pallas_src>
import functools

import jax
import jax.numpy as jnp
from jax import lax
from jax.experimental import pallas as pl
from jax.experimental.pallas import tpu as pltpu


# ----------------------------------------------------------------------------
# Kernels: out^T tile = W(OC8, tile_k) @ A^T(tile_k, tile_m), fused bias + ReLU.
# ----------------------------------------------------------------------------
def _conv_kernel_single(a_ref, w_ref, b_ref, o_ref, *, apply_relu, negative_slope):
    # a_ref: (tile_k, tile_m) bf16   w_ref: (OC8, tile_k) bf16
    # b_ref: (OC8, 1) f32            o_ref: (OC8, tile_m) f32
    acc = jnp.dot(w_ref[...], a_ref[...], preferred_element_type=jnp.float32)
    acc = acc + b_ref[...]
    if apply_relu:
        acc = jnp.maximum(acc, negative_slope * acc)   # LeakyReLU(0.1)
    o_ref[...] = acc


def _conv_kernel_acc(a_ref, w_ref, b_ref, o_ref, *, apply_relu, negative_slope):
    # K is tiled; o_ref's block index is constant across k -> VMEM-resident
    # accumulator, no scratch needed.
    k = pl.program_id(2)
    prod = jnp.dot(w_ref[...], a_ref[...], preferred_element_type=jnp.float32)

    @pl.when(k == 0)
    def _first():
        o_ref[...] = prod

    @pl.when(k > 0)
    def _rest():
        o_ref[...] += prod

    @pl.when(k == pl.num_programs(2) - 1)
    def _finalize():
        acc = o_ref[...] + b_ref[...]
        if apply_relu:
            acc = jnp.maximum(acc, negative_slope * acc)
        o_ref[...] = acc


# ----------------------------------------------------------------------------
# VMEM budget / tiling.
# ----------------------------------------------------------------------------
def _vmem_budget_bytes():
    cap = 64 * 1024 * 1024
    try:
        info = pltpu.get_tpu_info()
        rep = getattr(info, "vmem_capacity_bytes", None)
        if rep:
            cap = int(rep)
    except Exception:
        pass
    # v7x has 64 MiB per TensorCore; get_tpu_info may report per-chip capacity.
    # Clamp so two concurrently-running cores never oversubscribe VMEM.
    return min(cap, 64 * 1024 * 1024)


def _pick_tiles(OHW, K, OC8, budget_bytes):
    usable = int(budget_bytes * 0.70)
    MAX_TK = 2048

    if K <= MAX_TK:
        tile_k = K
    else:
        nk0 = (K + MAX_TK - 1) // MAX_TK
        base = (K + nk0 - 1) // nk0
        tile_k = ((base + 127) // 128) * 128          # balanced, 128-aligned

    def w_bytes(tk):                                   # resident W (double-buffered bf16) + bias
        return 2 * OC8 * tk * 2 + 2 * OC8 * 4

    # Shrink tile_k if the resident weight block alone would eat the budget.
    while w_bytes(tile_k) > usable // 2 and tile_k > 256:
        tile_k = max(256, (((tile_k + 1) // 2 + 127) // 128) * 128)

    if tile_k >= K:
        tile_k, nk, K_pad = K, 1, K
    else:
        nk = (K + tile_k - 1) // tile_k
        K_pad = nk * tile_k

    fixed = w_bytes(tile_k)
    # Bytes per output column: A double-buffer (bf16) + output double-buffer (f32).
    per_col = 2 * tile_k * 2 + 2 * OC8 * 4
    cap_m = max(128, min(2048, (max(0, usable - fixed) // per_col) // 128 * 128))
    tile_m = OHW if OHW <= cap_m else cap_m
    footprint = fixed + per_col * max(tile_m, 128)
    return tile_m, tile_k, K_pad, nk, footprint


# ----------------------------------------------------------------------------
# Forward pass equivalent to the PyTorch Conv2d module.
#   x: (N, C, H, W)  weight: (OC, C, KH, KW)  bias: (OC,)  ->  (N, OC, OH, OW)
# ----------------------------------------------------------------------------
def conv2d_forward(x, weight, bias, *, stride=1, relu=True, same_padding=False):
    N, C, H, W = x.shape
    OC, IC, KH, KW = weight.shape
    assert IC == C
    ph = (KH - 1) // 2 if same_padding else 0
    pw = (KW - 1) // 2 if same_padding else 0

    x_bf = x.astype(jnp.bfloat16)
    x_pad = jnp.pad(x_bf, ((0, 0), (0, 0), (ph, ph), (pw, pw)))
    Hp, Wp = H + 2 * ph, W + 2 * pw
    OH = (Hp - KH) // stride + 1
    OW = (Wp - KW) // stride + 1
    OHW = OH * OW
    K = KH * KW * C

    # Patch matrix A^T in (N, K, OH*OW) layout, K ordered (kh, kw, c).
    # Built with strided slices + one stack; the reshape is contiguous (no 6-D
    # transpose, no NHWC conversion).
    patches = [
        x_pad[:, :, kh:kh + stride * OH:stride, kw:kw + stride * OW:stride]
        for kh in range(KH) for kw in range(KW)
    ]  # each (N, C, OH, OW)
    a = jnp.stack(patches, axis=1).reshape(N, K, OHW)          # bf16

    # Weight (OC, K) with matching (kh, kw, c) order; OC padded only to mult of 8.
    OC8 = max(8, ((OC + 7) // 8) * 8)
    w_mat = weight.transpose(0, 2, 3, 1).reshape(OC, K).astype(jnp.bfloat16)
    b_mat = bias.astype(jnp.float32).reshape(OC, 1)
    if OC8 != OC:
        w_mat = jnp.pad(w_mat, ((0, OC8 - OC), (0, 0)))
        b_mat = jnp.pad(b_mat, ((0, OC8 - OC), (0, 0)))        # zeros stay zero

    budget = _vmem_budget_bytes()
    tile_m, tile_k, K_pad, nk, footprint = _pick_tiles(OHW, K, OC8, budget)
    if K_pad != K:
        a = jnp.pad(a, ((0, 0), (0, K_pad - K), (0, 0)))
        w_mat = jnp.pad(w_mat, ((0, 0), (0, K_pad - K)))       # exact no-op in acc

    grid_m = (OHW + tile_m - 1) // tile_m
    # Make sure both v7x TensorCores get work when a single image fits one tile.
    if N * grid_m < 2 and OHW >= 256:
        tile_m = (((OHW + 1) // 2 + 127) // 128) * 128
        grid_m = (OHW + tile_m - 1) // tile_m

    vmem_limit = min(64 * 1024 * 1024,
                     max(32 * 1024 * 1024, footprint + 8 * 1024 * 1024))

    if nk == 1:
        kernel = functools.partial(_conv_kernel_single,
                                   apply_relu=relu, negative_slope=0.1)
        grid = (N, grid_m)
        in_specs = [
            pl.BlockSpec((None, tile_k, tile_m), lambda n, i: (n, 0, i)),  # A^T tile
            pl.BlockSpec((OC8, tile_k),          lambda n, i: (0, 0)),     # W (resident)
            pl.BlockSpec((OC8, 1),               lambda n, i: (0, 0)),     # bias
        ]
        out_specs = pl.BlockSpec((None, OC8, tile_m), lambda n, i: (n, 0, i))
        dim_sem = ("parallel", "parallel")
    else:
        kernel = functools.partial(_conv_kernel_acc,
                                   apply_relu=relu, negative_slope=0.1)
        grid = (N, grid_m, nk)
        in_specs = [
            pl.BlockSpec((None, tile_k, tile_m), lambda n, i, k: (n, k, i)),
            pl.BlockSpec((OC8, tile_k),          lambda n, i, k: (0, k)),
            pl.BlockSpec((OC8, 1),               lambda n, i, k: (0, 0)),
        ]
        out_specs = pl.BlockSpec((None, OC8, tile_m), lambda n, i, k: (n, 0, i))
        dim_sem = ("parallel", "parallel", "arbitrary")

    out = pl.pallas_call(
        kernel,
        out_shape=jax.ShapeDtypeStruct((N, OC8, OHW), jnp.float32),
        grid_spec=pltpu.PrefetchScalarGridSpec(
            num_scalar_prefetch=0,
            grid=grid,
            in_specs=in_specs,
            out_specs=out_specs,
        ),
        compiler_params=pltpu.CompilerParams(
            dimension_semantics=dim_sem,
            vmem_limit_bytes=vmem_limit),
    )(a, w_mat, b_mat)

    # Contiguous un-pad + reshape back to NCHW (no transpose needed).
    out = out[:, :OC, :].reshape(N, OC, OH, OW)
    return out


if __name__ == "__main__":
    # Module config: Conv2d(in_channels=4, out_channels=8, kernel_size=3,
    #                       stride=1, relu=True, same_padding=True)
    N, C, H, W = 2, 4, 16, 16
    OC, KH, KW = 8, 3, 3
    stride, relu, same_padding = 1, True, True

    key = jax.random.PRNGKey(0)
    kx, kw_, kb = jax.random.split(key, 3)
    x = jax.random.normal(kx, (N, C, H, W), dtype=jnp.float32)
    fan_in = C * KH * KW
    bound = 1.0 / (fan_in ** 0.5)
    weight = jax.random.uniform(kw_, (OC, C, KH, KW), jnp.float32, -bound, bound)
    bias = jax.random.uniform(kb, (OC,), jnp.float32, -bound, bound)

    fwd = jax.jit(functools.partial(conv2d_forward, stride=stride, relu=relu,
                                    same_padding=same_padding))
    out = fwd(x, weight, bias)
    out = jax.block_until_ready(out)

    # Reference (nn.Conv2d + LeakyReLU(0.1)); inputs cast to bf16 to mirror the
    # kernel's bf16-in / f32-accumulate MXU path.
    pad = (KH - 1) // 2 if same_padding else 0
    ref = lax.conv_general_dilated(
        x.astype(jnp.bfloat16), weight.astype(jnp.bfloat16),
        window_strides=(stride, stride),
        padding=[(pad, pad), (pad, pad)],
        dimension_numbers=("NCHW", "OIHW", "NCHW"),
        preferred_element_type=jnp.float32)
    ref = ref + bias.reshape(1, OC, 1, 1)
    if relu:
        ref = jnp.maximum(ref, 0.1 * ref)

    assert out.shape == ref.shape
    assert jnp.allclose(out, ref, atol=1e-2, rtol=1e-2), float(
        jnp.max(jnp.abs(out - ref)))

    print("KERNEL_OK")
</pallas_src>

<mosaic_0001>
module attributes {stable_mosaic.version = 11 : i64} {
  func.func @_conv_kernel_single(%arg0: i32, %arg1: i32, %arg2: memref<1x36x256xbf16, #tpu.memory_space<vmem>>, %arg3: memref<8x36xbf16, #tpu.memory_space<vmem>>, %arg4: memref<8x1xf32, #tpu.memory_space<vmem>>, %arg5: memref<1x8x256xf32, #tpu.memory_space<vmem>>) attributes {dimension_semantics = [#tpu.dimension_semantics<parallel>, #tpu.dimension_semantics<parallel>], iteration_bounds = array<i64: 2, 1>, scalar_prefetch = 0 : i64, scratch_operands = 0 : i64, tpu.core_type = #tpu.core_type<tc>, window_params = [{transform_indices = @transform_0, window_bounds = array<i64: 1, 36, 256>}, {pipeline_mode = #tpu.pipeline_mode<synchronous>, transform_indices = @transform_1, window_bounds = array<i64: 8, 36>}, {pipeline_mode = #tpu.pipeline_mode<synchronous>, transform_indices = @transform_2, window_bounds = array<i64: 8, 1>}, {transform_indices = @transform_3, window_bounds = array<i64: 1, 8, 256>}]} {
    %c0 = arith.constant 0 : index
    %c0_0 = arith.constant 0 : index
    %0 = vector.load %arg3[%c0, %c0_0] : memref<8x36xbf16, #tpu.memory_space<vmem>>, vector<8x36xbf16>
    %c0_1 = arith.constant 0 : index
    %c0_2 = arith.constant 0 : index
    %c0_3 = arith.constant 0 : index
    %1 = vector.load %arg2[%c0_1, %c0_2, %c0_3] : memref<1x36x256xbf16, #tpu.memory_space<vmem>>, vector<1x36x256xbf16>
    %2 = vector.shape_cast %1 : vector<1x36x256xbf16> to vector<36x256xbf16>
    %cst = arith.constant dense<0.000000e+00> : vector<8x256xf32>
    %3 = tpu.matmul %0, %2, %cst {dimension_numbers = #tpu.dot_dimension_numbers<[1], [0], [0], [1], [0, 0, 1, 1], [], []>} : vector<8x36xbf16>, vector<36x256xbf16>, vector<8x256xf32> -> vector<8x256xf32>
    %c0_4 = arith.constant 0 : index
    %c0_5 = arith.constant 0 : index
    %4 = vector.load %arg4[%c0_4, %c0_5] : memref<8x1xf32, #tpu.memory_space<vmem>>, vector<8x1xf32>
    %5 = vector.broadcast %4 : vector<8x1xf32> to vector<8x256xf32>
    %6 = arith.addf %3, %5 : vector<8x256xf32>
    %cst_6 = arith.constant 1.000000e-01 : f32
    %7 = vector.broadcast %cst_6 : f32 to vector<8x256xf32>
    %8 = arith.mulf %7, %6 : vector<8x256xf32>
    %9 = arith.maximumf %6, %8 : vector<8x256xf32>
    %c0_7 = arith.constant 0 : index
    %c0_8 = arith.constant 0 : index
    %c0_9 = arith.constant 0 : index
    %10 = vector.load %arg5[%c0_7, %c0_8, %c0_9] : memref<1x8x256xf32, #tpu.memory_space<vmem>>, vector<1x8x256xf32>
    %11 = vector.shape_cast %10 : vector<1x8x256xf32> to vector<8x256xf32>
    %12 = vector.shape_cast %9 : vector<8x256xf32> to vector<1x8x256xf32>
    tpu.vector_store %arg5[%c0_7, %c0_8, %c0_9], %12 {strides = array<i32>} : memref<1x8x256xf32, #tpu.memory_space<vmem>>, vector<1x8x256xf32>,
    return
  }
  func.func @transform_0(%arg0: i32, %arg1: i32) -> (i32, i32, i32) {
    %c0_i32 = arith.constant 0 : i32
    %c0_i32_0 = arith.constant 0 : i32
    return %arg0, %c0_i32, %arg1 : i32, i32, i32
  }
  func.func @transform_1(%arg0: i32, %arg1: i32) -> (i32, i32) {
    %c0_i32 = arith.constant 0 : i32
    %c0_i32_0 = arith.constant 0 : i32
    %c0_i32_1 = arith.constant 0 : i32
    return %c0_i32, %c0_i32_0 : i32, i32
  }
  func.func @transform_2(%arg0: i32, %arg1: i32) -> (i32, i32) {
    %c0_i32 = arith.constant 0 : i32
    %c0_i32_0 = arith.constant 0 : i32
    %c0_i32_1 = arith.constant 0 : i32
    return %c0_i32, %c0_i32_0 : i32, i32
  }
  func.func @transform_3(%arg0: i32, %arg1: i32) -> (i32, i32, i32) {
    %c0_i32 = arith.constant 0 : i32
    %c0_i32_0 = arith.constant 0 : i32
    return %arg0, %c0_i32, %arg1 : i32, i32, i32
  }
}

</mosaic_0001>

<bundles_post_ra>
// kernel: conv2d_forward.1
= control target key start
LH: loop header
LB: loop body
LE: loop exit
PB: predicated region body
PF: predicated region fallthrough
CT: control target
= control target key end

     0   :  { %s492_s12 = smov 0   ;;  %s494_s13 = smov 0   ;;  %s535_s0 = inlined_call_operand.vmem [shape: bf16[2,36,256], index: 0, kind: input, shape index: {}]   ;;  %s536_s1 = inlined_call_operand.vmem [shape: bf16[8,36], index: 1, kind: input, shape index: {}]   ;;  %s537_s2 = inlined_call_operand.vmem [shape: f32[8,1], index: 2, kind: input, shape index: {}]   ;;  %s538_s3 = inlined_call_operand.vmem [shape: f32[2,8,256], index: 3, kind: output, shape index: {}]  }
   0x1   :  { %s496_s14 = smov 0  }
   0x2 LB: > { %s25_s15 = sadd.s32 1, %s465_s13  ;;  %p397_p0 = scmp.ge.s32.totalorder %s469_s14, 1  ;;  %s469_s14 = sphi %s496_s14, %s13_s14   ;;  %s465_s13 = sphi %s494_s13, %s540_s13   ;;  %s461_s12 = sphi %s492_s12, %s539_s12  }
   0x3   : > { %p27_p1 = scmp.ge.s32.totalorder %s25_s15, 2  ;;  %p158_p2 = scmp.lt.s32.totalorder %s469_s14, 3 }
   0x5   : > { %s542_s15 = smov (%p27_p1, %s25_s15), 0  ;;  %p159_p3 = pnand %p397_p0, %p158_p2 }
   0x6   : > { %p191_p4 = scmp.lt.s32.totalorder (!%p159_p3), %s461_s12, 1  ;;  %v471_v0 = vmov (!%p159_p3), 0   ;;  %v217_v1 = vld [vmem:[%s537_s2] sm:$0xff] (!%p159_p3)  ;;  %vm252_vm0 = vcmask (!%p159_p3), 1041408   ;;  %vm248_vm1 = vcmask (!%p159_p3), 293888  }
   0x7   : > { %162 = sbr.rel (%p159_p3) target bundleno = 251 (0xfb), region = 32  ;;  %291 = vmatprep.mubr.bf16.mxu0 (!%p159_p3), %v471_v0  ;;  %438 = vset.pattern.permute.xlu0 (!%p159_p3), %v471_v0  ;;  %v211_v10 = vld [vmem:[%s536_s1] sm:$0xf] (!%p159_p3) }
   0x8   : > { %220 = vperm.xlu0 (!%p159_p3), %438, %v217_v1  }
   0xe   : > { %s544_s12 = smov (!%p191_p4, %s461_s12), 1 }
   0xf   : > { %s412_s18 = smul.u32 40, %s544_s12  ;;  %s411_s24 = sshll.u32 %s544_s12, 4 }
  0x10   : > { %s208_s27 = scalar_lea.vmem %s538_s3, %s411_s24 }
  0x11   : > { %s198_s21 = scalar_lea.vmem %s535_s0, %s412_s18 }
  0x12   : > { %v439_v2 = vld [vmem:[%s198_s21 + $0x4] ss:$8 sps:$4 sm:$0xff]   ;;  %v441_v3 = vld [vmem:[%s198_s21] ss:$8 sps:$4 sm:$0xff]   ;;  %v442_v4 = vld [vmem:[%s198_s21 + $0x14] ss:$8 sps:$4 sm:$0xff]  }
  0x13   : > { %259 = vmatprep.subr.bf16.mxu0 %v439_v2  ;;  %v216_v5 = vld [vmem:[%s198_s21 + $0x20] sm:$0x33]  ;;  %v444_v6 = vld [vmem:[%s198_s21 + $0x10] ss:$8 sps:$4 sm:$0xff]  }
  0x14   : > { %260 = vmatpush1.bf16.msra.mxu0 %v441_v3  ;;  %v406_v7 = vcombine.high %v216_v5, %v216_v5  ;;  %v405_v8 = vcombine.low %v216_v5, %v216_v5 }
  0x15   : > { %261 = vmatprep.subr.bf16.mxu0 %v442_v4 }
  0x16   : > { %v254_v9 = vsel %vm252_vm0, %v405_v8, 0 }
  0x18   : > { %262 = vmatpush1.bf16.msra.mxu0 %v444_v6 }
  0x19   : > { %407 = vmatprep.subr.msk.bf16.mxu0 %vm252_vm0, %v406_v7 }
  0x1c   : > { %264 = vmatpush1.bf16.msra.mxu0 %v254_v9 }
  0x1f   : > { %408 = vmatmul.mubr.msk.bf16.vlgmr.msra.gmra.mrb[0].mxu0 %vm248_vm1, %v211_v10 }
  0x87   : > { %v221_v11 = vpop.permute.xlu0 %220 }
  0xf2   : > { %v293_v12 = vpop.f32.mrb[0].mxu0 }
  0xf3   : > { %v294_v13 = vadd.f32 %v293_v12, %v221_v11  ;;  %v295_v14 = vpop.f32.mrb[1].mxu0 }
  0xf4   : > { %v296_v15 = vadd.f32 %v295_v14, %v221_v11  ;;  %v297_v16 = vpop.f32.mrb[2].mxu0 }
  0xf5   : > { %v300_v17 = vmul.f32 0.1, %v294_v13  ;;  %v298_v18 = vpop.f32.mrb[3].mxu0 }
  0xf6   : > { %v301_v19 = vmul.f32 0.1, %v296_v15 }
  0xf7   : > { %v302_v20 = vmax.f32 %v294_v13, %v300_v17 }
  0xf8   : > { %v303_v21 = vmax.f32 %v296_v15, %v301_v19 }
  0xf9   : > { %304 = vst [vmem:[%s208_s27] sm:$0xff] %v302_v20 }
  0xfa   : > { %305 = vst [vmem:[%s208_s27 + $0x8] sm:$0xff] %v303_v21 }
  0xfb PF: > { %s13_s14 = sadd.s32 1, %s469_s14   ;;  %s539_s12 = smov %s465_s13 }
  0xfc   : > { %p10_p5 = scmp.ge.s32.totalorder %s13_s14, 4   ;;  %s540_s13 = smov %s542_s15 }
  0xfe   :  { %12 = sbr.rel (!%p10_p5) target bundleno = 2 (0x2), region = 62 }

</bundles_post_ra>
